<compile_context>
chip_gen: v6e
topology: v6e:2x2x1
jax: 0.10.0
libtpu: 0.0.40
codegen_flags: <defaults>
</compile_context>

<pallas_src>
import jax
import jax.numpy as jnp
from jax import lax
from jax.experimental import pallas as pl
from jax.experimental.pallas import tpu as pltpu

_LANE = 128


def _fused_matvec_kernel(x_ref, w_ref, lwt_ref, o_ref):
    # x_ref:   (1, M)    input row (resident across the whole grid)
    # w_ref:   (TK, M)   weight[k_tile, :]        (contiguous stream)
    # lwt_ref: (TK, M)   lin_w.T[k_tile, :]       (contiguous stream)
    # o_ref:   (1, 1, M) f32 partial-output row for this split (resident
    #                    accumulator across the reduction axis)
    k = pl.program_id(1)

    @pl.when(k == 0)
    def _init():
        o_ref[...] = jnp.zeros_like(o_ref)

    # v_tile (1, TK) = x (1, M) . weight_tile (TK, M): contract M on both
    # operands -> the stored (N, M) layout is streamed as-is, no transpose.
    v_tile = lax.dot_general(
        x_ref[...], w_ref[...],
        dimension_numbers=(((1,), (1,)), ((), ())),
        preferred_element_type=jnp.float32,
    )
    # out (1, M) += v_tile (1, TK) . lin_w_t_tile (TK, M): contract TK.
    # v stays f32; the streamed lin_w tile is upcast (VPU cast hides under DMA).
    contrib = lax.dot_general(
        v_tile, lwt_ref[...].astype(jnp.float32),
        dimension_numbers=(((1,), (0,)), ((), ())),
        preferred_element_type=jnp.float32,
    )
    o_ref[...] += contrib[None]


def _device_vmem_bytes():
    try:
        return int(pltpu.get_tpu_info().vmem_capacity_bytes)
    except Exception:
        return 64 << 20  # conservative fallback: v7x has 64 MiB per TensorCore


def _pick_tk(n_pad, m, dtype_bytes, budget_bytes):
    """Largest TK (multiple of 128, dividing n_pad) whose two double-buffered
    (TK, M) weight streams fit the budget. Floor is one lane tile (128).
    # TODO(synk): if M is ever huge enough that even TK=128 busts VMEM, tile M too.
    """
    per_row = 2 * 2 * m * dtype_bytes          # 2 streams x 2 pipeline buffers
    cap = min(max(budget_bytes // per_row, _LANE), n_pad)
    tk = (cap // _LANE) * _LANE
    while tk > _LANE and n_pad % tk != 0:
        tk -= _LANE
    return max(tk, _LANE)


def prepare_params(weight, lin_w):
    """One-time, parameter-load-time transform (NOT per call):
      * lin_w (M, N) -> lin_w.T (N, M) so the kernel streams contiguous
        (TK, M) blocks of both weight matrices,
      * zero-pad the reduction dim N up to a multiple of 128 so the kernel
        never needs an un-tiled full-N fallback (padded rows contribute 0).
    """
    n, m = weight.shape
    assert lin_w.shape == (m, n)
    n_pad = ((n + _LANE - 1) // _LANE) * _LANE
    lw_t = lin_w.T
    if n_pad != n:
        weight = jnp.pad(weight, ((0, n_pad - n), (0, 0)))
        lw_t = jnp.pad(lw_t, ((0, n_pad - n), (0, 0)))
    return weight, lw_t


def mymodule_forward(x, weight_p, lin_w_t_p, lin_b, *,
                     num_splits=1, vmem_budget_bytes=None):
    """x: (M,), weight_p: (N_pad, M), lin_w_t_p: (N_pad, M), lin_b: (M,) -> (M,) f32.

    weight_p / lin_w_t_p come from prepare_params (padded, lin_w pre-transposed)
    and are used in whatever dtype they carry (f32 or bf16); accumulation is f32.
    num_splits=2 splits the reduction over a leading 'parallel' grid axis
    (second TensorCore on v7x; runs serially and stays correct on v5e/v6e).
    """
    n_pad, m = weight_p.shape
    assert lin_w_t_p.shape == (n_pad, m)
    assert x.shape == (m,)
    assert lin_b.shape == (m,)
    assert weight_p.dtype == lin_w_t_p.dtype, "both weight streams must share a dtype"

    w_dtype = weight_p.dtype
    dtype_bytes = jnp.dtype(w_dtype).itemsize
    x_row = x.reshape(1, m).astype(w_dtype)     # tiny; cheap cast

    phys_vmem = _device_vmem_bytes()
    if vmem_budget_bytes is None:
        # ~72% of physical for the double-buffered weight streams:
        # ~92 MiB on v5e/v6e (128 MiB), ~46 MiB on v7x (64 MiB).
        vmem_budget_bytes = (phys_vmem * 18) // 25

    tk = _pick_tk(n_pad, m, dtype_bytes, vmem_budget_bytes)
    kt = n_pad // tk

    splits = max(1, min(int(num_splits), kt))
    if kt % splits != 0:
        splits = 1
    kt_per = kt // splits

    # Generation-aware VMEM request: streams + small residents + headroom,
    # clamped below physical capacity (so it is valid on v7x's 64 MiB).
    tile_bytes = 2 * 2 * tk * m * dtype_bytes
    small_bytes = 8 * m * 4
    vmem_limit = int(min(max(tile_bytes + small_bytes + (2 << 20), 16 << 20),
                         phys_vmem - (4 << 20)))

    cost = pl.CostEstimate(
        flops=4 * m * n_pad,                                   # two matvecs
        transcendentals=0,
        bytes_accessed=2 * n_pad * m * dtype_bytes + (2 + splits) * m * 4,
    )

    partials = pl.pallas_call(
        _fused_matvec_kernel,
        out_shape=jax.ShapeDtypeStruct((splits, 1, m), jnp.float32),
        grid_spec=pltpu.PrefetchScalarGridSpec(
            num_scalar_prefetch=0,
            grid=(splits, kt_per),
            in_specs=[
                pl.BlockSpec((1, m), lambda p, k: (0, 0)),                # x (resident)
                pl.BlockSpec((tk, m), lambda p, k: (p * kt_per + k, 0)),  # weight tile
                pl.BlockSpec((tk, m), lambda p, k: (p * kt_per + k, 0)),  # lin_w.T tile
            ],
            out_specs=pl.BlockSpec((1, 1, m), lambda p, k: (p, 0, 0)),    # partial row
        ),
        compiler_params=pltpu.CompilerParams(
            dimension_semantics=("parallel", "arbitrary"),
            vmem_limit_bytes=vmem_limit,
        ),
        cost_estimate=cost,
    )(x_row, weight_p, lin_w_t_p)

    # Tiny wrapper epilogue: sum the (<=2) partial rows and add the bias.
    return partials.sum(axis=0).reshape(m) + lin_b.astype(jnp.float32)


def reference_forward(x, weight, lin_w, lin_b):
    v = weight @ x            # (N,)
    return lin_w @ v + lin_b  # (M,)


if __name__ == "__main__":
    # --- Test 1: module-sized f32 (N=32, M=16), default device budget -------
    N, M = 32, 16
    k_w, k_lw, k_lb, k_x = jax.random.split(jax.random.PRNGKey(0), 4)
    weight = jax.random.uniform(k_w, (N, M), dtype=jnp.float32)      # torch.rand
    bound = 1.0 / (N ** 0.5)                                         # nn.Linear init
    lin_w = jax.random.uniform(k_lw, (M, N), dtype=jnp.float32,
                               minval=-bound, maxval=bound)
    lin_b = jax.random.uniform(k_lb, (M,), dtype=jnp.float32,
                               minval=-bound, maxval=bound)
    x = jax.random.normal(k_x, (M,), dtype=jnp.float32)

    w_p, lwt_p = prepare_params(weight, lin_w)
    out = jax.block_until_ready(mymodule_forward(x, w_p, lwt_p, lin_b))
    ref = reference_forward(x, weight, lin_w, lin_b)
    assert out.shape == (M,)
    assert jnp.allclose(out, ref, atol=1e-4, rtol=1e-4), (out, ref)

    # --- Test 2: bf16 weights, forced multi-tile + 2-way reduction split ----
    N2, M2 = 1024, 128
    k_w, k_lw, k_lb, k_x = jax.random.split(jax.random.PRNGKey(1), 4)
    weight2 = jax.random.uniform(k_w, (N2, M2), dtype=jnp.float32)
    bound2 = 1.0 / (N2 ** 0.5)
    lin_w2 = jax.random.uniform(k_lw, (M2, N2), dtype=jnp.float32,
                                minval=-bound2, maxval=bound2)
    lin_b2 = jax.random.uniform(k_lb, (M2,), dtype=jnp.float32,
                                minval=-bound2, maxval=bound2)
    x2 = jax.random.normal(k_x, (M2,), dtype=jnp.float32)

    w2_bf, lw2_bf = weight2.astype(jnp.bfloat16), lin_w2.astype(jnp.bfloat16)
    w2_p, lwt2_p = prepare_params(w2_bf, lw2_bf)
    out2 = jax.block_until_ready(
        mymodule_forward(x2, w2_p, lwt2_p, lin_b2,
                         num_splits=2, vmem_budget_bytes=256 << 10))
    # Mixed-precision reference matching the kernel: bf16 weights & x for the
    # first dot, f32 v, f32-upcast lin_w for the second dot.
    xb = x2.astype(jnp.bfloat16).astype(jnp.float32)
    v2 = w2_bf.astype(jnp.float32) @ xb
    ref2 = lw2_bf.astype(jnp.float32) @ v2 + lin_b2
    assert out2.shape == (M2,)
    assert jnp.allclose(out2, ref2, atol=1e-2, rtol=1e-2), (out2, ref2)

    # --- Test 3: f32, odd number of reduction tiles (split falls back to 1),
    #             exercises multi-step in-place accumulation ------------------
    N3, M3 = 384, 64
    k_w, k_lw, k_lb, k_x = jax.random.split(jax.random.PRNGKey(2), 4)
    weight3 = jax.random.uniform(k_w, (N3, M3), dtype=jnp.float32)
    bound3 = 1.0 / (N3 ** 0.5)
    lin_w3 = jax.random.uniform(k_lw, (M3, N3), dtype=jnp.float32,
                                minval=-bound3, maxval=bound3)
    lin_b3 = jax.random.uniform(k_lb, (M3,), dtype=jnp.float32,
                                minval=-bound3, maxval=bound3)
    x3 = jax.random.normal(k_x, (M3,), dtype=jnp.float32)
    w3_p, lwt3_p = prepare_params(weight3, lin_w3)
    out3 = jax.block_until_ready(
        mymodule_forward(x3, w3_p, lwt3_p, lin_b3,
                         num_splits=2, vmem_budget_bytes=96 << 10))
    ref3 = reference_forward(x3, weight3, lin_w3, lin_b3)
    assert jnp.allclose(out3, ref3, atol=1e-3, rtol=1e-3), (out3, ref3)

    print("KERNEL_OK")
</pallas_src>

<mosaic_0001>
module attributes {stable_mosaic.version = 11 : i64} {
  func.func @_fused_matvec_kernel(%arg0: i32, %arg1: i32, %arg2: memref<1x16xf32, #tpu.memory_space<vmem>>, %arg3: memref<128x16xf32, #tpu.memory_space<vmem>>, %arg4: memref<128x16xf32, #tpu.memory_space<vmem>>, %arg5: memref<1x1x16xf32, #tpu.memory_space<vmem>>) attributes {dimension_semantics = [#tpu.dimension_semantics<parallel>, #tpu.dimension_semantics<arbitrary>], iteration_bounds = array<i64: 1, 1>, scalar_prefetch = 0 : i64, scratch_operands = 0 : i64, tpu.core_type = #tpu.core_type<tc>, window_params = [{pipeline_mode = #tpu.pipeline_mode<synchronous>, transform_indices = @transform_0, window_bounds = array<i64: 1, 16>}, {transform_indices = @transform_1, window_bounds = array<i64: 128, 16>}, {transform_indices = @transform_2, window_bounds = array<i64: 128, 16>}, {transform_indices = @transform_3, window_bounds = array<i64: 1, 1, 16>}]} {
    %c0_i32 = arith.constant 0 : i32
    %0 = arith.cmpi eq, %arg1, %c0_i32 : i32
    %1 = arith.extui %0 : i1 to i32
    %c0_i32_0 = arith.constant 0 : i32
    %2 = arith.cmpi ne, %1, %c0_i32_0 : i32
    scf.if %2 {
      %cst_13 = arith.constant 0.000000e+00 : f32
      %12 = vector.broadcast %cst_13 : f32 to vector<1x1x16xf32>
      %c0_14 = arith.constant 0 : index
      %c0_15 = arith.constant 0 : index
      %c0_16 = arith.constant 0 : index
      %13 = vector.load %arg5[%c0_14, %c0_15, %c0_16] : memref<1x1x16xf32, #tpu.memory_space<vmem>>, vector<1x1x16xf32>
      tpu.vector_store %arg5[%c0_14, %c0_15, %c0_16], %12 {strides = array<i32>} : memref<1x1x16xf32, #tpu.memory_space<vmem>>, vector<1x1x16xf32>,
    } else {
    }
    %c0 = arith.constant 0 : index
    %c0_1 = arith.constant 0 : index
    %3 = vector.load %arg2[%c0, %c0_1] : memref<1x16xf32, #tpu.memory_space<vmem>>, vector<1x16xf32>
    %c0_2 = arith.constant 0 : index
    %c0_3 = arith.constant 0 : index
    %4 = vector.load %arg3[%c0_2, %c0_3] : memref<128x16xf32, #tpu.memory_space<vmem>>, vector<128x16xf32>
    %cst = arith.constant dense<0.000000e+00> : vector<1x128xf32>
    %5 = tpu.matmul %3, %4, %cst {dimension_numbers = #tpu.dot_dimension_numbers<[1], [1], [0], [0], [0, 0, 1, 0], [], []>} : vector<1x16xf32>, vector<128x16xf32>, vector<1x128xf32> -> vector<1x128xf32>
    %c0_4 = arith.constant 0 : index
    %c0_5 = arith.constant 0 : index
    %6 = vector.load %arg4[%c0_4, %c0_5] : memref<128x16xf32, #tpu.memory_space<vmem>>, vector<128x16xf32>
    %cst_6 = arith.constant dense<0.000000e+00> : vector<1x16xf32>
    %7 = tpu.matmul %5, %6, %cst_6 {dimension_numbers = #tpu.dot_dimension_numbers<[1], [0], [0], [1], [0, 0, 1, 1], [], []>} : vector<1x128xf32>, vector<128x16xf32>, vector<1x16xf32> -> vector<1x16xf32>
    %c0_7 = arith.constant 0 : index
    %c0_8 = arith.constant 0 : index
    %c0_9 = arith.constant 0 : index
    %8 = vector.load %arg5[%c0_7, %c0_8, %c0_9] : memref<1x1x16xf32, #tpu.memory_space<vmem>>, vector<1x1x16xf32>
    %9 = vector.shape_cast %7 : vector<1x16xf32> to vector<1x1x16xf32>
    %10 = arith.addf %8, %9 : vector<1x1x16xf32>
    %c0_10 = arith.constant 0 : index
    %c0_11 = arith.constant 0 : index
    %c0_12 = arith.constant 0 : index
    %11 = vector.load %arg5[%c0_10, %c0_11, %c0_12] : memref<1x1x16xf32, #tpu.memory_space<vmem>>, vector<1x1x16xf32>
    tpu.vector_store %arg5[%c0_10, %c0_11, %c0_12], %10 {strides = array<i32>} : memref<1x1x16xf32, #tpu.memory_space<vmem>>, vector<1x1x16xf32>,
    return
  }
  func.func @transform_0(%arg0: i32, %arg1: i32) -> (i32, i32) {
    %c0_i32 = arith.constant 0 : i32
    %c0_i32_0 = arith.constant 0 : i32
    %c0_i32_1 = arith.constant 0 : i32
    return %c0_i32, %c0_i32_0 : i32, i32
  }
  func.func @transform_1(%arg0: i32, %arg1: i32) -> (i32, i32) {
    %c1_i32 = arith.constant 1 : i32
    %0 = arith.muli %arg0, %c1_i32 : i32
    %1 = arith.addi %0, %arg1 : i32
    %c0_i32 = arith.constant 0 : i32
    %c0_i32_0 = arith.constant 0 : i32
    return %1, %c0_i32 : i32, i32
  }
  func.func @transform_2(%arg0: i32, %arg1: i32) -> (i32, i32) {
    %c1_i32 = arith.constant 1 : i32
    %0 = arith.muli %arg0, %c1_i32 : i32
    %1 = arith.addi %0, %arg1 : i32
    %c0_i32 = arith.constant 0 : i32
    %c0_i32_0 = arith.constant 0 : i32
    return %1, %c0_i32 : i32, i32
  }
  func.func @transform_3(%arg0: i32, %arg1: i32) -> (i32, i32, i32) {
    %c0_i32 = arith.constant 0 : i32
    %c0_i32_0 = arith.constant 0 : i32
    %c0_i32_1 = arith.constant 0 : i32
    return %arg0, %c0_i32, %c0_i32_0 : i32, i32, i32
  }
}

</mosaic_0001>

<bundles_post_ra>
// kernel: tpu_custom_call.1
= control target key start
LH: loop header
LB: loop body
LE: loop exit
PB: predicated region body
PF: predicated region fallthrough
CT: control target
= control target key end

     0   :  { %vm82_vm0 = vcmask 130048   ;;  %v466_v1 = vmov 0.0   ;;  %vm467_vm1 = vmmov 0   ;;  %s643_s0 = inlined_call_operand.vmem [shape: f32[1,16], index: 0, kind: input, shape index: {}]   ;;  %s644_s1 = inlined_call_operand.vmem [shape: f32[128,16], index: 1, kind: input, shape index: {}]   ;;  %s645_s2 = inlined_call_operand.vmem [shape: f32[128,16], index: 2, kind: input, shape index: {}]   ;;  %s646_s3 = inlined_call_operand.hbm [shape: f32[1,1,16], index: 3, kind: output, shape index: {}]  }
   0x1   :  { %v81_v0 = vld [vmem:[%s644_s1 + $0x78] sm:$0xff]  ;;  %371 = vmatprep.subr.mxu0 %v466_v1  ;;  %403 = vmatprep.mubr.msk.f32.mxu0 %vm467_vm1, %v466_v1  ;;  %v80_v2 = vld [vmem:[%s644_s1 + $0x70] sm:$0xff]  ;;  %v79_v5 = vld [vmem:[%s644_s1 + $0x68] sm:$0xff] }
   0x2   :  { %372 = vmatpush3.xpose.msk.msra.mxu0 %vm82_vm0, %v81_v0  ;;  %406 = vmatprep.subr.mxu1 %v466_v1  ;;  %v219_v3 = vld [vmem:[%s645_s2 + $0x78] sm:$0xff]  ;;  %v218_v4 = vld [vmem:[%s645_s2 + $0x70] sm:$0xff]  ;;  %v217_v6 = vld [vmem:[%s645_s2 + $0x68] sm:$0xff] }
   0x3   :  { %373 = vmatprep.subr.mxu0 %v466_v1  ;;  %438 = vmatprep.mubr.msk.f32.mxu1 %vm467_vm1, %v466_v1  ;;  %v216_v7 = vld [vmem:[%s645_s2 + $0x60] sm:$0xff] }
   0x4   :  { %407 = vmatpush3.msra.mxu1 %v219_v3 }
   0x5   :  { %408 = vmatprep.subr.mxu1 %v466_v1 }
   0x6   :  { %374 = vmatpush3.xpose.msk.msra.mxu0 %vm82_vm0, %v80_v2  ;;  %409 = vmatpush3.msra.mxu1 %v218_v4 }
   0x7   :  { %375 = vmatprep.subr.mxu0 %v466_v1  ;;  %410 = vmatprep.subr.mxu1 %v466_v1 }
   0x8   :  { %411 = vmatpush3.msra.mxu1 %v217_v6 }
   0xa   :  { %376 = vmatpush3.xpose.msk.msra.mxu0 %vm82_vm0, %v79_v5 }
   0xb   :  { %8 = vsyncpa [#allocation3], 0  ;;  %377 = vmatprep.subr.mxu0 %v466_v1  ;;  %v78_v8 = vld [vmem:[%s644_s1 + $0x60] sm:$0xff]  ;;  %412 = vmatprep.subr.mxu1 %v466_v1  ;;  %v215_v9 = vld [vmem:[%s645_s2 + $0x58] sm:$0xff]  ;;  %vm63_vm2 = vcmask 122880  }
   0xc   :  { %413 = vmatpush3.msra.mxu1 %v216_v7  ;;  %v214_v10 = vld [vmem:[%s645_s2 + $0x50] sm:$0xff]  ;;  %v77_v11 = vld [vmem:[%s644_s1 + $0x58] sm:$0xff]  ;;  %v213_v12 = vld [vmem:[%s645_s2 + $0x48] sm:$0xff]  ;;  %64 = vst.msk [vmem:[#allocation2] sm:$0x1] %vm63_vm2, %v466_v1 }
   0xd   :  { %414 = vmatprep.subr.mxu1 %v466_v1  ;;  %v212_v13 = vld [vmem:[%s645_s2 + $0x40] sm:$0xff]  ;;  %v76_v14 = vld [vmem:[%s644_s1 + $0x50] sm:$0xff]  ;;  %v211_v15 = vld [vmem:[%s645_s2 + $0x38] sm:$0xff] }
   0xe   :  { %378 = vmatpush3.xpose.msk.msra.mxu0 %vm82_vm0, %v78_v8  ;;  %415 = vmatpush3.msra.mxu1 %v215_v9  ;;  %v210_v16 = vld [vmem:[%s645_s2 + $0x30] sm:$0xff]  ;;  %v75_v17 = vld [vmem:[%s644_s1 + $0x48] sm:$0xff]  ;;  %v208_v19 = vld [vmem:[%s645_s2 + $0x20] sm:$0xff] }
   0xf   :  { %379 = vmatprep.subr.mxu0 %v466_v1  ;;  %416 = vmatprep.subr.mxu1 %v466_v1  ;;  %v209_v18 = vld [vmem:[%s645_s2 + $0x28] sm:$0xff]  ;;  %v74_v20 = vld [vmem:[%s644_s1 + $0x40] sm:$0xff]  ;;  %v207_v21 = vld [vmem:[%s645_s2 + $0x18] sm:$0xff] }
  0x10   :  { %417 = vmatpush3.msra.mxu1 %v214_v10  ;;  %v206_v22 = vld [vmem:[%s645_s2 + $0x10] sm:$0xff]  ;;  %v73_v23 = vld [vmem:[%s644_s1 + $0x38] sm:$0xff]  ;;  %v205_v24 = vld [vmem:[%s645_s2 + $0x8] sm:$0xff] }
  0x11   :  { %418 = vmatprep.subr.mxu1 %v466_v1  ;;  %v72_v25 = vld [vmem:[%s644_s1 + $0x30] sm:$0xff]  ;;  %v71_v26 = vld [vmem:[%s644_s1 + $0x28] sm:$0xff]  ;;  %v70_v27 = vld [vmem:[%s644_s1 + $0x20] sm:$0xff] }
  0x12   :  { %380 = vmatpush3.xpose.msk.msra.mxu0 %vm82_vm0, %v77_v11  ;;  %419 = vmatpush3.msra.mxu1 %v213_v12  ;;  %v69_v28 = vld [vmem:[%s644_s1 + $0x18] sm:$0xff]  ;;  %v68_v29 = vld [vmem:[%s644_s1 + $0x10] sm:$0xff]  ;;  %v67_v30 = vld [vmem:[%s644_s1 + $0x8] sm:$0xff] }
  0x13   :  { %381 = vmatprep.subr.mxu0 %v466_v1  ;;  %420 = vmatprep.subr.mxu1 %v466_v1  ;;  %v66_v31 = vld [vmem:[%s644_s1] sm:$0xff]  ;;  %s468_s1 = smov [#allocation2]  }
  0x14   :  { %421 = vmatpush3.msra.mxu1 %v212_v13  ;;  %v65_v32 = vld [vmem:[%s643_s0] sm:$0x1]  ;;  %s300_s24 = sshll.u32 %s468_s1, 4  ;;  %s301_s24 = int_to_ptr.vmem [resolvable:$true] %s300_s24 }
  0x15   :  { %422 = vmatprep.subr.mxu1 %v466_v1  ;;  %v204_v33 = vld [vmem:[%s645_s2] sm:$0xff]  ;;  %s444_s0 = scalar_lea.vmem %s301_s24, 16  ;;  %s448_s25 = scalar_lea.vmem %s301_s24, 32 }
  0x16   :  { %382 = vmatpush3.xpose.msk.msra.mxu0 %vm82_vm0, %v76_v14  ;;  %423 = vmatpush3.msra.mxu1 %v211_v15  ;;  %v290_v36 = vld [vmem:[#allocation2] sm:$0x1]  ;;  %p445_p0 = scmp.ne.s32.totalorder %s301_s24, %s444_s0  ;;  %p449_p1 = scmp.lt.s32.totalorder %s301_s24, %s301_s24 }
  0x17   :  { %383 = vmatprep.subr.mxu0 %v466_v1  ;;  %424 = vmatprep.subr.mxu1 %v466_v1  ;;  %p450_p2 = scmp.lt.s32.totalorder %s448_s25, %s444_s0 }
  0x18   :  { %425 = vmatpush3.msra.mxu1 %v210_v16 }
  0x19   :  { %426 = vmatprep.subr.mxu1 %v466_v1  ;;  %p451_p3 = por %p450_p2, %p449_p1 }
  0x1a   :  { %384 = vmatpush3.xpose.msk.msra.mxu0 %vm82_vm0, %v75_v17  ;;  %427 = vmatpush3.msra.mxu1 %v209_v18 }
  0x1b   :  { %385 = vmatprep.subr.mxu0 %v466_v1  ;;  %428 = vmatprep.subr.mxu1 %v466_v1  ;;  %p452_p4 = pnand %p451_p3, %p445_p0 }
  0x1c   :  { %429 = vmatpush3.msra.mxu1 %v208_v19 }
  0x1d   :  { %430 = vmatprep.subr.mxu1 %v466_v1 }
  0x1e   :  { %386 = vmatpush3.xpose.msk.msra.mxu0 %vm82_vm0, %v74_v20  ;;  %431 = vmatpush3.msra.mxu1 %v207_v21 }
  0x1f   :  { %387 = vmatprep.subr.mxu0 %v466_v1  ;;  %432 = vmatprep.subr.mxu1 %v466_v1 }
  0x20   :  { %433 = vmatpush3.msra.mxu1 %v206_v22 }
  0x21   :  { %434 = vmatprep.subr.mxu1 %v466_v1 }
  0x22   :  { %388 = vmatpush3.xpose.msk.msra.mxu0 %vm82_vm0, %v73_v23  ;;  %435 = vmatpush3.msra.mxu1 %v205_v24 }
  0x23   :  { %389 = vmatprep.subr.mxu0 %v466_v1  ;;  %436 = vmatprep.subr.mxu1 %v466_v1 }
  0x24   :  { %437 = vmatpush3.msra.mxu1 %v204_v33 }
  0x26   :  { %390 = vmatpush3.xpose.msk.msra.mxu0 %vm82_vm0, %v72_v25 }
  0x27   :  { %391 = vmatprep.subr.mxu0 %v466_v1 }
  0x2a   :  { %392 = vmatpush3.xpose.msk.msra.mxu0 %vm82_vm0, %v71_v26 }
  0x2b   :  { %393 = vmatprep.subr.mxu0 %v466_v1 }
  0x2e   :  { %394 = vmatpush3.xpose.msk.msra.mxu0 %vm82_vm0, %v70_v27 }
  0x2f   :  { %395 = vmatprep.subr.mxu0 %v466_v1 }
  0x32   :  { %396 = vmatpush3.xpose.msk.msra.mxu0 %vm82_vm0, %v69_v28 }
  0x33   :  { %397 = vmatprep.subr.mxu0 %v466_v1 }
  0x36   :  { %398 = vmatpush3.xpose.msk.msra.mxu0 %vm82_vm0, %v68_v29 }
  0x37   :  { %399 = vmatprep.subr.mxu0 %v466_v1 }
  0x3a   :  { %400 = vmatpush3.xpose.msk.msra.mxu0 %vm82_vm0, %v67_v30 }
  0x3b   :  { %401 = vmatprep.subr.mxu0 %v466_v1 }
  0x3e   :  { %402 = vmatpush3.xpose.msk.msra.mxu0 %vm82_vm0, %v66_v31 }
  0x41   :  { %404 = vmatmul.mubr.msk.f32.vlgmr.msra.gmra.mxu0 %vm82_vm0, %v65_v32 }
 0x101   :  { %v200_v34 = vpop.f32.mrf.mxu0 }
 0x102   :  { %439 = vmatmul.mubr.f32.vlgmr.msra.gmra.mxu1 %v200_v34 }
 0x103   :  { %v405_v35 = vpop.f32.mrf.mxu0 }
 0x1c2   :  { %v286_v37 = vpop.f32.mrf.mxu1 }
 0x1c3   :  { %v291_v38 = vadd.f32 %v290_v36, %v286_v37 }
 0x1c4   :  { %v440_v39 = vpop.f32.mrf.mxu1 }
 0x1c5   :  { %293 = vst.msk [vmem:[#allocation2] sm:$0x1] %vm63_vm2, %v291_v38 }
 0x1c6   :  { %455 = shalt.err (!%p452_p4)
}
 0x1c7   :  { %303 = dma.vmem_to_hbm [thread:$0]  %s301_s24, 16, %s646_s3, [#allocation3]  }
 0x1c8   :  { %464 = dma.done.wait [#allocation3], 16  }
 0x1c9   :  { %465 = vsyncadd [#allocation3], 4294967280 }
 0x1ca   :  { %307 = vsyncpa [#allocation3], 1 }

</bundles_post_ra>
